<compile_context>
chip_gen: v7x
topology: tpu7x:2x2x1
jax: 0.10.0
libtpu: 0.0.40
codegen_flags: <defaults>
</compile_context>

<pallas_src>
import functools

import jax
import jax.numpy as jnp
from jax.experimental import pallas as pl
from jax.experimental.pallas import tpu as pltpu

IN, H1, H2, OUT = 4, 64, 32, 4
SDIM = H1 + H2 + IN + 1   # streamed rows: [h1_prev; h2_prev2; x; ones] = 101
ODIM = H1 + H2 + OUT      # result rows:   [h1;      h2;       y]       = 100
CHUNK = 256               # lanes per pipeline stage (1 N-group on v6e/v7x, 2 on v5e)


def dqn_kernel(x_ref, w_ref, o_ref):
    """x_ref: [IN, TB] bf16, w_ref: [ODIM, SDIM] bf16, o_ref: [OUT, TB] f32."""
    tb = x_ref.shape[1]
    n_chunks = tb // CHUNK            # static (TB is a multiple of CHUNK)
    w_blk = w_ref[...]                # fused block-diagonal weight, VMEM-resident
    ones = jnp.ones((1, CHUNK), jnp.bfloat16)   # hoisted; drives the bias column

    # Pipeline carries (plain values in vregs, not VMEM slabs):
    #   h1 = relu(fc1) of chunk c-1, h2 = relu(fc2) of chunk c-2.
    # Zero-init keeps the prologue finite (block-diag zeros * NaN would poison).
    h1 = jnp.zeros((H1, CHUNK), jnp.bfloat16)
    h2 = jnp.zeros((H2, CHUNK), jnp.bfloat16)

    # Static loop: n_chunks real stages + 2 drain stages.  All slices below are
    # static and 256-lane aligned.
    for c in range(n_chunks + 2):
        xi = min(c, n_chunks - 1) * CHUNK          # drain steps re-read last chunk
        x_c = x_ref[:, xi:xi + CHUNK]              # [IN, CHUNK] bf16
        s = jnp.concatenate([h1, h2, x_c, ones], axis=0)            # [SDIM, CHUNK]
        p = jnp.dot(w_blk, s, preferred_element_type=jnp.float32)   # [ODIM, CHUNK]
        #   p[0:64]   = W1 @ x_c              + b1   -> pre-relu h1 of chunk c
        #   p[64:96]  = W2 @ relu(h1_{c-1})   + b2   -> pre-relu h2 of chunk c-1
        #   p[96:100] = W3 @ relu(h2_{c-2})   + b3   -> y of chunk c-2
        if c >= 2:                                  # y of chunk c-2 is ready
            o_ref[:, (c - 2) * CHUNK:(c - 1) * CHUNK] = p[H1 + H2:, :]
        h1 = jnp.maximum(p[:H1, :], 0.0).astype(jnp.bfloat16)
        h2 = jnp.maximum(p[H1:H1 + H2, :], 0.0).astype(jnp.bfloat16)


def _round_up(n, m):
    return ((n + m - 1) // m) * m


def pack_params(params):
    """Fold (w1,b1,w2,b2,w3,b3) — PyTorch nn.Linear layout: w [out,in], b [out] —
    into the single block-diagonal bf16 weight (biases in the last column)."""
    w1, b1, w2, b2, w3, b3 = params
    w = jnp.zeros((ODIM, SDIM), jnp.float32)
    w = w.at[0:H1, H1 + H2:H1 + H2 + IN].set(w1)       # h1 = W1 @ x
    w = w.at[H1:H1 + H2, 0:H1].set(w2)                 # h2 = W2 @ relu(h1_prev)
    w = w.at[H1 + H2:, H1:H1 + H2].set(w3)             # y  = W3 @ relu(h2_prev2)
    w = w.at[0:H1, SDIM - 1].set(b1.reshape(-1))       # biases ride the ones row
    w = w.at[H1:H1 + H2, SDIM - 1].set(b2.reshape(-1))
    w = w.at[H1 + H2:, SDIM - 1].set(b3.reshape(-1))
    return w.astype(jnp.bfloat16)


@functools.partial(jax.jit, static_argnames=("tile_b",))
def dqn_forward_fm(xt, params, *, tile_b=8192):
    """Feature-major forward: xt [IN, B] -> [OUT, B] f32 (no layout round trips).

    tile_b: lane-aligned batch tile (multiple of 256).  Default 8192 amortizes
    per-grid-step overhead while staying far under VMEM limits on v5e/v6e/v7x;
    sweep 4096-16384 at production batch sizes (keep <=8-16K on v7x)."""
    assert tile_b % CHUNK == 0 and tile_b >= CHUNK
    B = xt.shape[1]
    TB = min(tile_b, _round_up(B, CHUNK))      # chunk/lane-aligned batch tile
    Bp = _round_up(B, TB)
    grid = (Bp // TB,)

    xt = jnp.pad(xt.astype(jnp.bfloat16), ((0, 0), (0, Bp - B)))
    w_blk = pack_params(params)

    flops = 2 * Bp * ODIM * SDIM
    bytes_accessed = xt.size * 2 + Bp * OUT * 4 + w_blk.size * 2

    yt = pl.pallas_call(
        dqn_kernel,
        out_shape=jax.ShapeDtypeStruct((OUT, Bp), jnp.float32),
        grid=grid,
        in_specs=[
            pl.BlockSpec((IN, TB), lambda i: (0, i)),       # x^T tile, streamed
            pl.BlockSpec((ODIM, SDIM), lambda i: (0, 0)),   # fused weight, resident
        ],
        out_specs=pl.BlockSpec((OUT, TB), lambda i: (0, i)),  # lane-dense output
        compiler_params=pltpu.CompilerParams(
            dimension_semantics=("parallel",)),
        cost_estimate=pl.CostEstimate(
            flops=flops, transcendentals=0, bytes_accessed=bytes_accessed),
    )(xt, w_blk)
    return yt[:, :B]


@functools.partial(jax.jit, static_argnames=("tile_b",))
def dqn_forward(x, params, *, tile_b=8192):
    """PyTorch-facing forward: x [B, IN] -> [B, OUT].
    Prefer dqn_forward_fm in a feature-major pipeline to skip these transposes."""
    return dqn_forward_fm(x.T, params, tile_b=tile_b).T


def init_params(key):
    """PyTorch nn.Linear default init: U(-1/sqrt(fan_in), 1/sqrt(fan_in)).
    Weights [out, in], biases [out] (exactly the PyTorch layout)."""
    dims = [(IN, H1), (H1, H2), (H2, OUT)]
    params = []
    for fan_in, fan_out in dims:
        key, kw, kb = jax.random.split(key, 3)
        bound = 1.0 / (fan_in ** 0.5)
        w = jax.random.uniform(kw, (fan_out, fan_in), jnp.float32, -bound, bound)
        b = jax.random.uniform(kb, (fan_out,), jnp.float32, -bound, bound)
        params += [w, b]
    return tuple(params)


def reference_forward(x, params):
    """Pure-JAX reference with the same bf16 quantization of matmul inputs/biases."""
    w1, b1, w2, b2, w3, b3 = params
    q = lambda a: a.astype(jnp.bfloat16).astype(jnp.float32)
    h1 = jnp.maximum(q(x) @ q(w1).T + q(b1), 0.0)
    h2 = jnp.maximum(q(h1) @ q(w2).T + q(b2), 0.0)
    return q(h2) @ q(w3).T + q(b3)


if __name__ == "__main__":
    key = jax.random.PRNGKey(0)
    key, kx = jax.random.split(key)
    params = init_params(key)

    # Small demo batch (single chunk, single grid step).
    B = 8
    x = jax.random.normal(kx, (B, IN), jnp.float32)
    out = jax.block_until_ready(dqn_forward(x, params))
    ref = reference_forward(x, params)
    assert out.shape == (B, OUT)
    assert jnp.allclose(out, ref, atol=2e-2, rtol=2e-2)

    # Multi-chunk pipeline + batch padding (B not a multiple of 256).
    key, kx2 = jax.random.split(key)
    B2 = 1000
    x2 = jax.random.normal(kx2, (B2, IN), jnp.float32)
    out2 = jax.block_until_ready(dqn_forward(x2, params))
    assert out2.shape == (B2, OUT)
    assert jnp.allclose(out2, reference_forward(x2, params), atol=2e-2, rtol=2e-2)

    # Multi-grid-step path (grid > 1) with a small tile, plus the feature-major
    # entry point (no wrapper transposes).
    key, kx3 = jax.random.split(key)
    B3 = 600
    x3 = jax.random.normal(kx3, (B3, IN), jnp.float32)
    out3 = jax.block_until_ready(dqn_forward(x3, params, tile_b=512))
    assert out3.shape == (B3, OUT)
    assert jnp.allclose(out3, reference_forward(x3, params), atol=2e-2, rtol=2e-2)

    out_fm = jax.block_until_ready(dqn_forward_fm(x3.T, params, tile_b=512))
    assert jnp.allclose(out_fm.T, out3, atol=1e-5, rtol=1e-5)

    print("KERNEL_OK")
</pallas_src>

<mosaic_0001>
module attributes {stable_mosaic.version = 11 : i64} {
  func.func @dqn_kernel(%arg0: i32, %arg1: memref<4x256xbf16, #tpu.memory_space<vmem>>, %arg2: memref<100x101xbf16, #tpu.memory_space<vmem>>, %arg3: memref<4x256xf32, #tpu.memory_space<vmem>>) attributes {dimension_semantics = [#tpu.dimension_semantics<parallel>], iteration_bounds = array<i64: 1>, scalar_prefetch = 0 : i64, scratch_operands = 0 : i64, tpu.core_type = #tpu.core_type<tc>, window_params = [{transform_indices = @transform_0, window_bounds = array<i64: 4, 256>}, {pipeline_mode = #tpu.pipeline_mode<synchronous>, transform_indices = @transform_1, window_bounds = array<i64: 100, 101>}, {transform_indices = @transform_2, window_bounds = array<i64: 4, 256>}]} {
    %c0 = arith.constant 0 : index
    %c0_0 = arith.constant 0 : index
    %0 = vector.load %arg2[%c0, %c0_0] : memref<100x101xbf16, #tpu.memory_space<vmem>>, vector<100x101xbf16>
    %cst = arith.constant 1.000000e+00 : bf16
    %1 = vector.broadcast %cst : bf16 to vector<1x256xbf16>
    %cst_1 = arith.constant 0.000000e+00 : bf16
    %2 = vector.broadcast %cst_1 : bf16 to vector<64x256xbf16>
    %cst_2 = arith.constant 0.000000e+00 : bf16
    %3 = vector.broadcast %cst_2 : bf16 to vector<32x256xbf16>
    %c0_3 = arith.constant 0 : index
    %c0_4 = arith.constant 0 : index
    %4 = vector.load %arg1[%c0_3, %c0_4] : memref<4x256xbf16, #tpu.memory_space<vmem>>, vector<4x256xbf16>
    %5 = tpu.concatenate %2, %3, %4, %1 in 0 : vector<64x256xbf16>, vector<32x256xbf16>, vector<4x256xbf16>, vector<1x256xbf16> -> vector<101x256xbf16>
    %cst_5 = arith.constant dense<0.000000e+00> : vector<100x256xf32>
    %6 = tpu.matmul %0, %5, %cst_5 {dimension_numbers = #tpu.dot_dimension_numbers<[1], [0], [0], [1], [0, 0, 1, 1], [], []>} : vector<100x101xbf16>, vector<101x256xbf16>, vector<100x256xf32> -> vector<100x256xf32>
    %7 = vector.extract_strided_slice %6 {offsets = [0, 0], sizes = [64, 256], strides = [1, 1]} : vector<100x256xf32> to vector<64x256xf32>
    %cst_6 = arith.constant 0.000000e+00 : f32
    %8 = vector.broadcast %cst_6 : f32 to vector<64x256xf32>
    %9 = arith.maximumf %7, %8 : vector<64x256xf32>
    %10 = arith.truncf %9 : vector<64x256xf32> to vector<64x256xbf16>
    %11 = vector.extract_strided_slice %6 {offsets = [64, 0], sizes = [32, 256], strides = [1, 1]} : vector<100x256xf32> to vector<32x256xf32>
    %cst_7 = arith.constant 0.000000e+00 : f32
    %12 = vector.broadcast %cst_7 : f32 to vector<32x256xf32>
    %13 = arith.maximumf %11, %12 : vector<32x256xf32>
    %14 = arith.truncf %13 : vector<32x256xf32> to vector<32x256xbf16>
    %c0_8 = arith.constant 0 : index
    %c0_9 = arith.constant 0 : index
    %15 = vector.load %arg1[%c0_8, %c0_9] : memref<4x256xbf16, #tpu.memory_space<vmem>>, vector<4x256xbf16>
    %16 = tpu.concatenate %10, %14, %15, %1 in 0 : vector<64x256xbf16>, vector<32x256xbf16>, vector<4x256xbf16>, vector<1x256xbf16> -> vector<101x256xbf16>
    %cst_10 = arith.constant dense<0.000000e+00> : vector<100x256xf32>
    %17 = tpu.matmul %0, %16, %cst_10 {dimension_numbers = #tpu.dot_dimension_numbers<[1], [0], [0], [1], [0, 0, 1, 1], [], []>} : vector<100x101xbf16>, vector<101x256xbf16>, vector<100x256xf32> -> vector<100x256xf32>
    %18 = vector.extract_strided_slice %17 {offsets = [0, 0], sizes = [64, 256], strides = [1, 1]} : vector<100x256xf32> to vector<64x256xf32>
    %cst_11 = arith.constant 0.000000e+00 : f32
    %19 = vector.broadcast %cst_11 : f32 to vector<64x256xf32>
    %20 = arith.maximumf %18, %19 : vector<64x256xf32>
    %21 = arith.truncf %20 : vector<64x256xf32> to vector<64x256xbf16>
    %22 = vector.extract_strided_slice %17 {offsets = [64, 0], sizes = [32, 256], strides = [1, 1]} : vector<100x256xf32> to vector<32x256xf32>
    %cst_12 = arith.constant 0.000000e+00 : f32
    %23 = vector.broadcast %cst_12 : f32 to vector<32x256xf32>
    %24 = arith.maximumf %22, %23 : vector<32x256xf32>
    %25 = arith.truncf %24 : vector<32x256xf32> to vector<32x256xbf16>
    %c0_13 = arith.constant 0 : index
    %c0_14 = arith.constant 0 : index
    %26 = vector.load %arg1[%c0_13, %c0_14] : memref<4x256xbf16, #tpu.memory_space<vmem>>, vector<4x256xbf16>
    %27 = tpu.concatenate %21, %25, %26, %1 in 0 : vector<64x256xbf16>, vector<32x256xbf16>, vector<4x256xbf16>, vector<1x256xbf16> -> vector<101x256xbf16>
    %cst_15 = arith.constant dense<0.000000e+00> : vector<100x256xf32>
    %28 = tpu.matmul %0, %27, %cst_15 {dimension_numbers = #tpu.dot_dimension_numbers<[1], [0], [0], [1], [0, 0, 1, 1], [], []>} : vector<100x101xbf16>, vector<101x256xbf16>, vector<100x256xf32> -> vector<100x256xf32>
    %29 = vector.extract_strided_slice %28 {offsets = [96, 0], sizes = [4, 256], strides = [1, 1]} : vector<100x256xf32> to vector<4x256xf32>
    %c0_16 = arith.constant 0 : index
    %c0_17 = arith.constant 0 : index
    %30 = vector.load %arg3[%c0_16, %c0_17] : memref<4x256xf32, #tpu.memory_space<vmem>>, vector<4x256xf32>
    tpu.vector_store %arg3[%c0_16, %c0_17], %29 {strides = array<i32>} : memref<4x256xf32, #tpu.memory_space<vmem>>, vector<4x256xf32>,
    return
  }
  func.func @transform_0(%arg0: i32) -> (i32, i32) {
    %c0_i32 = arith.constant 0 : i32
    %c0_i32_0 = arith.constant 0 : i32
    return %c0_i32, %arg0 : i32, i32
  }
  func.func @transform_1(%arg0: i32) -> (i32, i32) {
    %c0_i32 = arith.constant 0 : i32
    %c0_i32_0 = arith.constant 0 : i32
    %c0_i32_1 = arith.constant 0 : i32
    return %c0_i32, %c0_i32_0 : i32, i32
  }
  func.func @transform_2(%arg0: i32) -> (i32, i32) {
    %c0_i32 = arith.constant 0 : i32
    %c0_i32_0 = arith.constant 0 : i32
    return %c0_i32, %arg0 : i32, i32
  }
}

</mosaic_0001>

<bundles_post_ra>
// kernel: dqn_forward_fm.1
= control target key start
LH: loop header
LB: loop body
LE: loop exit
PB: predicated region body
PF: predicated region fallthrough
CT: control target
= control target key end

     0   :  { %v512_v0 = vmov 0   ;;  %vm36_vm0 = vcmask 1041408   ;;  %vm97_vm1 = vcmask 1042432   ;;  %v513_v3 = vmov 65535   ;;  %s672_s1 = inlined_call_operand.vmem [shape: bf16[100,101], index: 1, kind: input, shape index: {}]   ;;  %s673_s0 = inlined_call_operand.vmem [shape: bf16[4,256], index: 0, kind: input, shape index: {}]   ;;  %s674_s2 = inlined_call_operand.vmem [shape: f32[4,256], index: 2, kind: output, shape index: {}]  }
   0x1   :  { %104 = vmatprep.subr.bf16.mxu0 %v512_v0  ;;  %489 = vmatprep.subr.bf16.mxu1 %v512_v0  ;;  %v460_v1 = vld.sshfl [vmem:[%s673_s0] sm:$0x33 pattern:$0x76325410]  ;;  %v98_v4 = vsel %vm36_vm0, 4294967295, %v513_v3  ;;  %vm75_vm2 = vcmask 826368  }
   0x2   :  { %105 = vmatpush1.bf16.msra.mxu0 %v512_v0  ;;  %496 = vmatpush1.bf16.msra.mxu1 %v512_v0  ;;  %v35_v2 = vcombine.high %v460_v1, %v460_v1  ;;  %v99_v6 = vsel %vm97_vm1, %v98_v4, 0  ;;  %v39_v8 = vsel %vm36_vm0, %v460_v1, 1065369472  ;;  %v570_v10 = vld [vmem:[%s672_s1] sm:$0xff]   ;;  %v588_v12 = vld [vmem:[%s672_s1 + $0x8] sm:$0xff]   ;;  %v604_v14 = vld [vmem:[%s672_s1 + $0x10] sm:$0xff]  }
   0x3   :  { %106 = vmatprep.subr.bf16.mxu0 %v512_v0  ;;  %490 = vmatprep.subr.bf16.mxu1 %v512_v0  ;;  %v562_v9 = vand.u32 %v99_v6, %v39_v8  ;;  %v575_v11 = vld [vmem:[%s672_s1 + $0x20] sm:$0xff]   ;;  %v593_v13 = vld [vmem:[%s672_s1 + $0x28] sm:$0xff]   ;;  %v612_v15 = vld [vmem:[%s672_s1 + $0x18] sm:$0xff]  }
   0x4   :  { %136 = vmatprep.mubr.bf16.mxu0 %v512_v0  ;;  %176 = vmatprep.mubr.bf16.mxu1 %v512_v0  ;;  %v41_v5 = vsel %vm36_vm0, %v35_v2, 1065369472  ;;  %v620_v16 = vld [vmem:[%s672_s1 + $0x30] ss:$0 sps:$4 sm:$0x33]  }
   0x5   :  { %v557_v7 = vand.u32 %v99_v6, %v41_v5 }
   0x6   :  { %107 = vmatpush1.bf16.msra.mxu0 %v512_v0  ;;  %497 = vmatpush1.bf16.msra.mxu1 %v512_v0 }
   0x7   :  { %108 = vmatprep.subr.bf16.mxu0 %v512_v0  ;;  %491 = vmatprep.subr.bf16.mxu1 %v512_v0 }
   0xa   :  { %109 = vmatpush1.bf16.msra.mxu0 %v512_v0  ;;  %498 = vmatpush1.bf16.msra.mxu1 %v512_v0 }
   0xb   :  { %110 = vmatprep.subr.bf16.mxu0 %v512_v0  ;;  %492 = vmatprep.subr.bf16.mxu1 %v512_v0 }
   0xe   :  { %111 = vmatpush1.bf16.msra.mxu0 %v512_v0  ;;  %499 = vmatpush1.bf16.msra.mxu1 %v512_v0 }
   0xf   :  { %112 = vmatprep.subr.bf16.mxu0 %v512_v0  ;;  %493 = vmatprep.subr.bf16.mxu1 %v512_v0 }
  0x12   :  { %113 = vmatpush1.bf16.msra.mxu0 %v512_v0  ;;  %500 = vmatpush1.bf16.msra.mxu1 %v512_v0 }
  0x13   :  { %114 = vmatprep.subr.bf16.mxu0 %v512_v0  ;;  %494 = vmatprep.subr.bf16.mxu1 %v512_v0 }
  0x16   :  { %115 = vmatpush1.bf16.msra.mxu0 %v512_v0  ;;  %501 = vmatpush1.bf16.msra.mxu1 %v512_v0 }
  0x17   :  { %116 = vmatprep.subr.bf16.mxu0 %v557_v7  ;;  %495 = vmatprep.subr.bf16.mxu1 %v557_v7 }
  0x1a   :  { %117 = vmatpush1.bf16.msra.mxu0 %v562_v9  ;;  %502 = vmatpush1.bf16.msra.mxu1 %v562_v9 }
  0x1d   :  { %468 = vmatmul.mubr.msk.bf16.vlgmr.msra.gmra.mrb[0].mxu0 %vm75_vm2, %v570_v10  ;;  %472 = vmatmul.mubr.msk.bf16.vlgmr.msra.gmra.mrb[0].mxu1 %vm75_vm2, %v575_v11 }
  0x1e   :  { %146 = vmatprep.mubr.bf16.mxu0 %v512_v0  ;;  %186 = vmatprep.mubr.bf16.mxu1 %v512_v0 }
  0x25   :  { %469 = vmatmul.mubr.msk.bf16.gmra.mrb[4].mxu0 %vm75_vm2, %v588_v12  ;;  %473 = vmatmul.mubr.msk.bf16.gmra.mrb[4].mxu1 %vm75_vm2, %v593_v13 }
  0x26   :  { %156 = vmatprep.mubr.bf16.mxu0 %v512_v0  ;;  %196 = vmatprep.mubr.bf16.mxu1 %v512_v0 }
  0x2d   :  { %470 = vmatmul.mubr.msk.bf16.gmra.mrb[8].mxu0 %vm75_vm2, %v604_v14  ;;  %474 = vmatmul.mubr.msk.bf16.gmra.mrb[8].mxu1 %vm75_vm2, %v620_v16 }
  0x2e   :  { %166 = vmatprep.mubr.bf16.mxu0 %v512_v0  ;;  %271 = vmatprep.mubr.bf16.mxu1 %v512_v0 }
  0x35   :  { %471 = vmatmul.mubr.msk.bf16.gmra.mrb[12].mxu0 %vm75_vm2, %v612_v15 }
  0x36   :  { %406 = vmatprep.mubr.bf16.mxu0 %v512_v0 }
  0xf0   :  { %v138_v17 = vpop.f32.mrb[0].mxu0  ;;  %v178_v18 = vpop.f32.mrb[0].mxu1 }
  0xf1   :  { %v140_v19 = vpop.f32.mrb[1].mxu0  ;;  %v227_v20 = vmax.f32 %v178_v18, 0.0  ;;  %v180_v21 = vpop.f32.mrb[1].mxu1  ;;  %v203_v25 = vmax.f32 %v138_v17, 0.0 }
  0xf2   :  { %v142_v22 = vpop.f32.mrb[2].mxu0  ;;  %v228_v23 = vmax.f32 %v180_v21, 0.0  ;;  %v182_v24 = vpop.f32.mrb[2].mxu1  ;;  %v204_v30 = vmax.f32 %v140_v19, 0.0 }
  0xf3   :  { %v205_v26 = vmax.f32 %v142_v22, 0.0  ;;  %v144_v27 = vpop.f32.mrb[3].mxu0  ;;  %v229_v28 = vmax.f32 %v182_v24, 0.0  ;;  %v184_v29 = vpop.f32.mrb[3].mxu1 }
  0xf4   :  { %v206_v31 = vmax.f32 %v144_v27, 0.0  ;;  %v230_v32 = vmax.f32 %v184_v29, 0.0 }
  0xf5   :  { %v219_v33 = vpack.c.bf16 %v205_v26, %v203_v25  ;;  %v235_v34 = vpack.c.bf16 %v229_v28, %v227_v20 }
  0xf6   :  { %v220_v35 = vpack.c.bf16 %v206_v31, %v204_v30  ;;  %v236_v36 = vpack.c.bf16 %v230_v32, %v228_v23 }
  0xf8   :  { %v148_v37 = vpop.f32.mrb[4].mxu0  ;;  %239 = vmatprep.subr.bf16.mxu1 %v220_v35  ;;  %v188_v38 = vpop.f32.mrb[4].mxu1 }
  0xf9   :  { %v150_v39 = vpop.f32.mrb[5].mxu0  ;;  %240 = vmatpush1.bf16.msra.mxu1 %v219_v33  ;;  %v231_v40 = vmax.f32 %v188_v38, 0.0  ;;  %v190_v41 = vpop.f32.mrb[5].mxu1  ;;  %v207_v45 = vmax.f32 %v148_v37, 0.0 }
  0xfa   :  { %v152_v42 = vpop.f32.mrb[6].mxu0  ;;  %v232_v43 = vmax.f32 %v190_v41, 0.0  ;;  %v192_v44 = vpop.f32.mrb[6].mxu1  ;;  %v208_v50 = vmax.f32 %v150_v39, 0.0 }
  0xfb   :  { %v209_v46 = vmax.f32 %v152_v42, 0.0  ;;  %v154_v47 = vpop.f32.mrb[7].mxu0  ;;  %v233_v48 = vmax.f32 %v192_v44, 0.0  ;;  %v194_v49 = vpop.f32.mrb[7].mxu1 }
  0xfc   :  { %v210_v51 = vmax.f32 %v154_v47, 0.0  ;;  %v234_v52 = vmax.f32 %v194_v49, 0.0 }
  0xfd   :  { %v221_v53 = vpack.c.bf16 %v209_v46, %v207_v45  ;;  %v237_v54 = vpack.c.bf16 %v233_v48, %v231_v40 }
  0xfe   :  { %v222_v55 = vpack.c.bf16 %v210_v51, %v208_v50  ;;  %v238_v56 = vpack.c.bf16 %v234_v52, %v232_v43 }
 0x100   :  { %v158_v57 = vpop.f32.mrb[8].mxu0  ;;  %241 = vmatprep.subr.bf16.mxu1 %v222_v55  ;;  %v198_v23 = vpop.f32.mrb[8].mxu1 }
 0x101   :  { %v160_v58 = vpop.f32.mrb[9].mxu0  ;;  %242 = vmatpush1.bf16.msra.mxu1 %v221_v53  ;;  %v211_v60 = vmax.f32 %v158_v57, 0.0  ;;  %v199_v24 = vpop.f32.mrb[9].mxu1 }
 0x102   :  { %v162_v59 = vpop.f32.mrb[10].mxu0  ;;  %v212_v63 = vmax.f32 %v160_v58, 0.0  ;;  %v200_v25 = vpop.f32.mrb[10].mxu1 }
 0x103   :  { %v213_v61 = vmax.f32 %v162_v59, 0.0  ;;  %v164_v62 = vpop.f32.mrb[11].mxu0  ;;  %v201_v26 = vpop.f32.mrb[11].mxu1 }
 0x104   :  { %v214_v1 = vmax.f32 %v164_v62, 0.0 }
 0x105   :  { %v223_v2 = vpack.c.bf16 %v213_v61, %v211_v60 }
 0x106   :  { %v224_v3 = vpack.c.bf16 %v214_v1, %v212_v63 }
 0x108   :  { %v168_v4 = vpop.f32.mrb[12].mxu0  ;;  %243 = vmatprep.subr.bf16.mxu1 %v224_v3 }
 0x109   :  { %v170_v5 = vpop.f32.mrb[13].mxu0  ;;  %244 = vmatpush1.bf16.msra.mxu1 %v223_v2  ;;  %v215_v8 = vmax.f32 %v168_v4, 0.0 }
 0x10a   :  { %v172_v6 = vpop.f32.mrb[14].mxu0  ;;  %v216_v19 = vmax.f32 %v170_v5, 0.0 }
 0x10b   :  { %v217_v17 = vmax.f32 %v172_v6, 0.0  ;;  %v174_v18 = vpop.f32.mrb[15].mxu0 }
 0x10c   :  { %v218_v20 = vmax.f32 %v174_v18, 0.0 }
 0x10d   :  { %v225_v21 = vpack.c.bf16 %v217_v17, %v215_v8 }
 0x10e   :  { %v226_v22 = vpack.c.bf16 %v218_v20, %v216_v19 }
 0x110   :  { %245 = vmatprep.subr.bf16.mxu1 %v226_v22 }
 0x111   :  { %246 = vmatpush1.bf16.msra.mxu1 %v225_v21 }
 0x112   :  { %247 = vmatprep.subr.bf16.mxu1 %v236_v36 }
 0x115   :  { %248 = vmatpush1.bf16.msra.mxu1 %v235_v34 }
 0x116   :  { %249 = vmatprep.subr.bf16.mxu1 %v238_v56 }
 0x119   :  { %250 = vmatpush1.bf16.msra.mxu1 %v237_v54 }
 0x11a   :  { %251 = vmatprep.subr.bf16.mxu1 %v557_v7 }
 0x11d   :  { %252 = vmatpush1.bf16.msra.mxu1 %v562_v9 }
 0x120   :  { %475 = vmatmul.mubr.msk.bf16.vlgmr.msra.gmra.mrb[12].mxu1 %vm75_vm2, %v570_v10 }
 0x121   :  { %281 = vmatprep.mubr.bf16.mxu1 %v512_v0 }
 0x128   :  { %476 = vmatmul.mubr.msk.bf16.gmra.mrb[16].mxu1 %vm75_vm2, %v588_v12 }
 0x129   :  { %291 = vmatprep.mubr.bf16.mxu1 %v512_v0 }
 0x130   :  { %477 = vmatmul.mubr.msk.bf16.gmra.mrb[20].mxu1 %vm75_vm2, %v604_v14 }
 0x131   :  { %301 = vmatprep.mubr.bf16.mxu1 %v512_v0 }
 0x138   :  { %478 = vmatmul.mubr.msk.bf16.gmra.mrb[24].mxu1 %vm75_vm2, %v612_v15 }
 0x139   :  { %311 = vmatprep.mubr.bf16.mxu1 %v512_v0 }
 0x140   :  { %479 = vmatmul.mubr.msk.bf16.gmra.mrb[28].mxu1 %vm75_vm2, %v575_v11 }
 0x141   :  { %321 = vmatprep.mubr.bf16.mxu1 %v512_v0 }
 0x148   :  { %480 = vmatmul.mubr.msk.bf16.gmra.mrb[32].mxu1 %vm75_vm2, %v593_v13 }
 0x149   :  { %331 = vmatprep.mubr.bf16.mxu1 %v512_v0 }
 0x150   :  { %481 = vmatmul.mubr.msk.bf16.gmra.mrb[36].mxu1 %vm75_vm2, %v620_v16 }
 0x1f3   :  { %v273_v27 = vpop.f32.mrb[12].mxu1 }
 0x1f4   :  { %v275_v28 = vpop.f32.mrb[13].mxu1  ;;  %v338_v30 = vmax.f32 %v273_v27, 0.0 }
 0x1f5   :  { %v277_v29 = vpop.f32.mrb[14].mxu1  ;;  %v339_v33 = vmax.f32 %v275_v28, 0.0 }
 0x1f6   :  { %v340_v31 = vmax.f32 %v277_v29, 0.0  ;;  %v279_v32 = vpop.f32.mrb[15].mxu1 }
 0x1f7   :  { %v341_v34 = vmax.f32 %v279_v32, 0.0 }
 0x1f8   :  { %v354_v35 = vpack.c.bf16 %v340_v31, %v338_v30 }
 0x1f9   :  { %v355_v36 = vpack.c.bf16 %v341_v34, %v339_v33 }
 0x1fb   :  { %v283_v37 = vpop.f32.mrb[16].mxu1  ;;  %374 = vmatprep.subr.bf16.mxu0 %v355_v36 }
 0x1fc   :  { %v285_v38 = vpop.f32.mrb[17].mxu1  ;;  %375 = vmatpush1.bf16.msra.mxu0 %v354_v35  ;;  %v342_v40 = vmax.f32 %v283_v37, 0.0 }
 0x1fd   :  { %v287_v39 = vpop.f32.mrb[18].mxu1  ;;  %v343_v43 = vmax.f32 %v285_v38, 0.0 }
 0x1fe   :  { %v344_v41 = vmax.f32 %v287_v39, 0.0  ;;  %v289_v42 = vpop.f32.mrb[19].mxu1 }
 0x1ff   :  { %v345_v44 = vmax.f32 %v289_v42, 0.0 }
 0x200   :  { %v356_v45 = vpack.c.bf16 %v344_v41, %v342_v40 }
 0x201   :  { %v357_v46 = vpack.c.bf16 %v345_v44, %v343_v43 }
 0x203   :  { %v293_v47 = vpop.f32.mrb[20].mxu1  ;;  %376 = vmatprep.subr.bf16.mxu0 %v357_v46 }
 0x204   :  { %v295_v48 = vpop.f32.mrb[21].mxu1  ;;  %377 = vmatpush1.bf16.msra.mxu0 %v356_v45  ;;  %v346_v50 = vmax.f32 %v293_v47, 0.0 }
 0x205   :  { %v297_v49 = vpop.f32.mrb[22].mxu1  ;;  %v347_v53 = vmax.f32 %v295_v48, 0.0 }
 0x206   :  { %v348_v51 = vmax.f32 %v297_v49, 0.0  ;;  %v299_v52 = vpop.f32.mrb[23].mxu1 }
 0x207   :  { %v349_v54 = vmax.f32 %v299_v52, 0.0 }
 0x208   :  { %v358_v55 = vpack.c.bf16 %v348_v51, %v346_v50 }
 0x209   :  { %v359_v56 = vpack.c.bf16 %v349_v54, %v347_v53 }
 0x20b   :  { %v303_v57 = vpop.f32.mrb[24].mxu1  ;;  %378 = vmatprep.subr.bf16.mxu0 %v359_v56 }
 0x20c   :  { %v305_v58 = vpop.f32.mrb[25].mxu1  ;;  %379 = vmatpush1.bf16.msra.mxu0 %v358_v55  ;;  %v350_v60 = vmax.f32 %v303_v57, 0.0 }
 0x20d   :  { %v307_v59 = vpop.f32.mrb[26].mxu1  ;;  %v351_v63 = vmax.f32 %v305_v58, 0.0 }
 0x20e   :  { %v352_v61 = vmax.f32 %v307_v59, 0.0  ;;  %v309_v62 = vpop.f32.mrb[27].mxu1 }
 0x20f   :  { %v353_v1 = vmax.f32 %v309_v62, 0.0 }
 0x210   :  { %v360_v2 = vpack.c.bf16 %v352_v61, %v350_v60 }
 0x211   :  { %v361_v3 = vpack.c.bf16 %v353_v1, %v351_v63 }
 0x213   :  { %v313_v4 = vpop.f32.mrb[28].mxu1  ;;  %380 = vmatprep.subr.bf16.mxu0 %v361_v3 }
 0x214   :  { %v315_v5 = vpop.f32.mrb[29].mxu1  ;;  %381 = vmatpush1.bf16.msra.mxu0 %v360_v2  ;;  %v362_v8 = vmax.f32 %v313_v4, 0.0 }
 0x215   :  { %v317_v6 = vpop.f32.mrb[30].mxu1  ;;  %v363_v19 = vmax.f32 %v315_v5, 0.0 }
 0x216   :  { %v364_v17 = vmax.f32 %v317_v6, 0.0  ;;  %v319_v18 = vpop.f32.mrb[31].mxu1 }
 0x217   :  { %v365_v20 = vmax.f32 %v319_v18, 0.0 }
 0x218   :  { %v370_v21 = vpack.c.bf16 %v364_v17, %v362_v8 }
 0x219   :  { %v371_v22 = vpack.c.bf16 %v365_v20, %v363_v19 }
 0x21b   :  { %v323_v23 = vpop.f32.mrb[32].mxu1  ;;  %382 = vmatprep.subr.bf16.mxu0 %v371_v22 }
 0x21c   :  { %v325_v24 = vpop.f32.mrb[33].mxu1  ;;  %383 = vmatpush1.bf16.msra.mxu0 %v370_v21  ;;  %v366_v26 = vmax.f32 %v323_v23, 0.0 }
 0x21d   :  { %v327_v25 = vpop.f32.mrb[34].mxu1  ;;  %v367_v29 = vmax.f32 %v325_v24, 0.0 }
 0x21e   :  { %v368_v27 = vmax.f32 %v327_v25, 0.0  ;;  %v329_v28 = vpop.f32.mrb[35].mxu1 }
 0x21f   :  { %v369_v30 = vmax.f32 %v329_v28, 0.0 }
 0x220   :  { %v372_v31 = vpack.c.bf16 %v368_v27, %v366_v26 }
 0x221   :  { %v373_v32 = vpack.c.bf16 %v369_v30, %v367_v29 }
 0x223   :  { %384 = vmatprep.subr.bf16.mxu0 %v373_v32  ;;  %v333_v33 = vpop.f32.mrb[36].mxu1 }
 0x224   :  { %385 = vmatpush1.bf16.msra.mxu0 %v372_v31  ;;  %v334_v34 = vpop.f32.mrb[37].mxu1 }
 0x225   :  { %386 = vmatprep.subr.bf16.mxu0 %v557_v7  ;;  %v335_v35 = vpop.f32.mrb[38].mxu1 }
 0x226   :  { %v336_v36 = vpop.f32.mrb[39].mxu1 }
 0x228   :  { %387 = vmatpush1.bf16.msra.mxu0 %v562_v9 }
 0x22b   :  { %482 = vmatmul.mubr.msk.bf16.vlgmr.msra.gmra.mrb[16].mxu0 %vm75_vm2, %v570_v10 }
 0x22c   :  { %412 = vmatprep.mubr.bf16.mxu0 %v512_v0 }
 0x233   :  { %483 = vmatmul.mubr.msk.bf16.gmra.mrb[20].mxu0 %vm75_vm2, %v588_v12 }
 0x234   :  { %418 = vmatprep.mubr.bf16.mxu0 %v512_v0 }
 0x23b   :  { %484 = vmatmul.mubr.msk.bf16.gmra.mrb[24].mxu0 %vm75_vm2, %v604_v14 }
 0x23c   :  { %424 = vmatprep.mubr.bf16.mxu0 %v512_v0 }
 0x243   :  { %485 = vmatmul.mubr.msk.bf16.gmra.mrb[28].mxu0 %vm75_vm2, %v612_v15 }
 0x244   :  { %430 = vmatprep.mubr.bf16.mxu0 %v512_v0 }
 0x24b   :  { %486 = vmatmul.mubr.msk.bf16.gmra.mrb[32].mxu0 %vm75_vm2, %v575_v11 }
 0x24c   :  { %436 = vmatprep.mubr.bf16.mxu0 %v512_v0 }
 0x253   :  { %487 = vmatmul.mubr.msk.bf16.gmra.mrb[36].mxu0 %vm75_vm2, %v593_v13 }
 0x254   :  { %442 = vmatprep.mubr.bf16.mxu0 %v512_v0 }
 0x25b   :  { %488 = vmatmul.mubr.msk.bf16.gmra.mrb[40].mxu0 %vm75_vm2, %v620_v16 }
 0x2fe   :  { %v408_v7 = vpop.f32.mrb[16].mxu0 }
 0x2ff   :  { %v409_v9 = vpop.f32.mrb[17].mxu0 }
 0x300   :  { %v410_v10 = vpop.f32.mrb[18].mxu0 }
 0x301   :  { %v411_v12 = vpop.f32.mrb[19].mxu0 }
 0x306   :  { %v414_v14 = vpop.f32.mrb[20].mxu0 }
 0x307   :  { %v415_v15 = vpop.f32.mrb[21].mxu0 }
 0x308   :  { %v416_v37 = vpop.f32.mrb[22].mxu0 }
 0x309   :  { %v417_v38 = vpop.f32.mrb[23].mxu0 }
 0x30e   :  { %v420_v39 = vpop.f32.mrb[24].mxu0 }
 0x30f   :  { %v421_v11 = vpop.f32.mrb[25].mxu0 }
 0x310   :  { %v422_v40 = vpop.f32.mrb[26].mxu0 }
 0x311   :  { %v423_v41 = vpop.f32.mrb[27].mxu0 }
 0x316   :  { %v426_v42 = vpop.f32.mrb[28].mxu0 }
 0x317   :  { %v427_v43 = vpop.f32.mrb[29].mxu0 }
 0x318   :  { %v428_v13 = vpop.f32.mrb[30].mxu0 }
 0x319   :  { %v429_v44 = vpop.f32.mrb[31].mxu0 }
 0x31e   :  { %v432_v0 = vpop.f32.mrb[32].mxu0 }
 0x31f   :  { %v433_v45 = vpop.f32.mrb[33].mxu0 }
 0x320   :  { %v434_v46 = vpop.f32.mrb[34].mxu0 }
 0x321   :  { %v435_v16 = vpop.f32.mrb[35].mxu0 }
 0x326   :  { %v438_v47 = vpop.f32.mrb[36].mxu0 }
 0x327   :  { %v439_v48 = vpop.f32.mrb[37].mxu0 }
 0x328   :  { %v440_v49 = vpop.f32.mrb[38].mxu0 }
 0x329   :  { %v441_v50 = vpop.f32.mrb[39].mxu0 }
 0x32e   :  { %v444_v51 = vpop.f32.mrb[40].mxu0 }
 0x32f   :  { %v446_v52 = vpop.f32.mrb[41].mxu0 }
 0x330   :  { %v453_v53 = vcombine.low %v444_v51, %v446_v52  ;;  %v448_v54 = vpop.f32.mrb[42].mxu0 }
 0x331   :  { %v449_v55 = vpop.f32.mrb[43].mxu0 }
 0x332   :  { %455 = vst [vmem:[%s674_s2] sm:$0xff] %v453_v53 }

</bundles_post_ra>
